<compile_context>
chip_gen: v6e
topology: v6e:2x2x1
jax: 0.10.0
libtpu: 0.0.40
codegen_flags: <defaults>
</compile_context>

<pallas_src>
import numpy as np
import jax
import jax.numpy as jnp
from jax.experimental import pallas as pl
from jax.experimental.pallas import tpu as pltpu


def _weighted_ce_kernel(logits_ref, labels_ref, weights_ref, num_ref, den_ref):
    """One grid step processes one (block_rows, V) block of logits.

    grid = (num_shards, blocks_per_shard); the inner axis is the reduction.

    logits_ref : (TR, V)          native dtype, cast to f32 in-kernel
    labels_ref : (rows_padded, 1) i32, VMEM-resident (block index constant)
    weights_ref: (rows_padded, 1) f32, VMEM-resident
    num_ref    : (TR, 1) f32  per-shard, per-row-slot accumulator of loss*w
    den_ref    : (TR, 1) f32  per-shard, per-row-slot accumulator of w
    """
    i = pl.program_id(1)                      # inner (reduction) axis
    tr = num_ref.shape[0]                     # block_rows (static)

    @pl.when(i == 0)
    def _():
        num_ref[...] = jnp.zeros_like(num_ref)
        den_ref[...] = jnp.zeros_like(den_ref)

    x = logits_ref[...].astype(jnp.float32)   # (TR, V) — cast after the DMA

    # global block id -> row offset into the resident labels/weights arrays
    g = pl.program_id(0) * pl.num_programs(1) + i
    start = pl.multiple_of(g * tr, 8)
    labels = labels_ref[pl.ds(start, tr), :]  # (TR, 1) i32
    w = weights_ref[pl.ds(start, tr), :]      # (TR, 1) f32

    # stable per-row log-sum-exp over the vocab (lane) axis
    m = jnp.max(x, axis=-1, keepdims=True)                           # (TR, 1)
    lse = m + jnp.log(jnp.sum(jnp.exp(x - m), axis=-1, keepdims=True))

    # target-logit gather: one-hot compare + lane reduce
    col = jax.lax.broadcasted_iota(jnp.int32, x.shape, 1)            # (TR, V)
    tgt = jnp.sum(jnp.where(col == labels, x, 0.0), axis=-1, keepdims=True)

    loss = lse - tgt                                                 # (TR, 1)
    num_ref[...] += loss * w
    den_ref[...] += w


def _decayed_weights(seq_len, decay_method, decay_rate, base_weight=1.0):
    if decay_method == "exp":
        exps = np.linspace(np.log10(base_weight),
                           np.log10(base_weight * decay_rate ** (seq_len - 1)),
                           seq_len)
        return (10.0 ** exps).astype(np.float32)
    elif decay_method == "linear":
        return np.linspace(base_weight,
                           base_weight - decay_rate * (seq_len - 1),
                           seq_len).astype(np.float32)
    else:
        raise ValueError(f"Unknown decay method: {decay_method}")


def _round_up(x, m):
    return (x + m - 1) // m * m


def weighted_numeric_token_loss(logits, label_token_ids, numerical_token_ids,
                                decay_method="exp", decay_rate=0.5,
                                pad_token_id=0, block_rows=None, num_shards=2,
                                logits_vmem_budget_bytes=16 << 20):
    B, S, V = logits.shape
    assert label_token_ids.shape == (B, S)

    # ---- per-token weights (cheap glue, plain JAX) -------------------------
    decayed = jnp.asarray(_decayed_weights(S, decay_method, decay_rate))  # (S,)
    num_ids = jnp.asarray(numerical_token_ids, dtype=label_token_ids.dtype)
    is_num = (label_token_ids[..., None] == num_ids[None, None, :]).any(-1)
    cs = jnp.cumsum(is_num.astype(jnp.int32), axis=-1)
    idx = jnp.where(is_num, cs - 1, 0)
    weights = decayed[idx]                                            # (B, S)
    weights = jnp.where(label_token_ids == pad_token_id, 0.0, weights)

    # ---- tiling decisions ---------------------------------------------------
    rows = B * S
    itemsize = jnp.dtype(logits.dtype).itemsize
    v_pad = _round_up(V, 128)                       # lane padding of the vocab dim
    if block_rows is None:
        br = logits_vmem_budget_bytes // (2 * v_pad * itemsize)   # double-buffered
        br = max(8, min(1024, (br // 8) * 8))
        br = min(br, _round_up(rows, 8))            # don't over-tile tiny inputs
        block_rows = int(br)
    assert block_rows % 8 == 0
    num_shards = max(1, int(num_shards))

    rows_padded = _round_up(rows, block_rows * num_shards)
    blocks_per_shard = rows_padded // (block_rows * num_shards)

    # ---- operand layout (native logits dtype, zero-weight row padding) -----
    logits2 = logits.reshape(rows, V)                       # no f32 upcast here
    labels2 = label_token_ids.reshape(rows, 1).astype(jnp.int32)
    weights2 = weights.reshape(rows, 1).astype(jnp.float32)
    pad = rows_padded - rows
    if pad:
        logits2 = jnp.pad(logits2, ((0, pad), (0, 0)))
        labels2 = jnp.pad(labels2, ((0, pad), (0, 0)))      # pad labels -> 0
        weights2 = jnp.pad(weights2, ((0, pad), (0, 0)))    # pad weights -> 0 (exact)

    # ---- VMEM budget (double-buffered logits + resident labels/weights) ----
    est = (2 * block_rows * v_pad * itemsize            # logits blocks (x2 buffers)
           + 2 * 2 * rows_padded * 128 * 4              # labels+weights resident
           + 2 * 2 * block_rows * 128 * 4)              # per-row output blocks
    vmem_limit = int(max(32 << 20, est + est // 4 + (4 << 20)))

    out_num, out_den = pl.pallas_call(
        _weighted_ce_kernel,
        out_shape=(jax.ShapeDtypeStruct((num_shards * block_rows, 1), jnp.float32),
                   jax.ShapeDtypeStruct((num_shards * block_rows, 1), jnp.float32)),
        grid_spec=pltpu.PrefetchScalarGridSpec(
            num_scalar_prefetch=0,
            grid=(num_shards, blocks_per_shard),
            in_specs=[
                # streamed logits tiles
                pl.BlockSpec((block_rows, V),
                             lambda s, i, bps=blocks_per_shard: (s * bps + i, 0)),
                # labels / weights: whole (small) arrays, resident in VMEM
                pl.BlockSpec((rows_padded, 1), lambda s, i: (0, 0)),
                pl.BlockSpec((rows_padded, 1), lambda s, i: (0, 0)),
            ],
            out_specs=(
                pl.BlockSpec((block_rows, 1), lambda s, i: (s, 0)),
                pl.BlockSpec((block_rows, 1), lambda s, i: (s, 0)),
            ),
        ),
        compiler_params=pltpu.CompilerParams(
            dimension_semantics=("parallel", "arbitrary"),
            vmem_limit_bytes=vmem_limit),
    )(logits2, labels2, weights2)

    # tiny final reduction + divide in plain JAX (matches PyTorch semantics:
    # NaN if total weight is zero, same as sum(w*ce)/sum(w) in the module)
    return jnp.sum(out_num) / jnp.sum(out_den)


def _reference_loss(logits, labels, numerical_token_ids, decay_method,
                    decay_rate, pad_token_id):
    """Pure-JAX re-implementation of the PyTorch forward for verification."""
    B, S, V = logits.shape
    decayed = jnp.asarray(_decayed_weights(S, decay_method, decay_rate))
    num_ids = jnp.asarray(numerical_token_ids, dtype=labels.dtype)
    is_num = (labels[..., None] == num_ids[None, None, :]).any(-1)
    cs = jnp.cumsum(is_num.astype(jnp.int32), axis=-1)
    idx = jnp.where(is_num, cs - 1, 0)
    w = decayed[idx]
    w = jnp.where(labels == pad_token_id, 0.0, w)
    logp = jax.nn.log_softmax(logits.astype(jnp.float32), axis=-1)
    ce = -jnp.take_along_axis(logp, labels[..., None], axis=-1)[..., 0]
    return jnp.sum(ce * w) / jnp.sum(w)


if __name__ == "__main__":
    B, S, V = 2, 8, 128
    numerical_token_ids = [5, 7, 11]
    pad_token_id = 0

    key = jax.random.PRNGKey(0)
    k_logits, k_labels = jax.random.split(key)
    logits = jax.random.normal(k_logits, (B, S, V), dtype=jnp.float32)
    labels = jax.random.randint(k_labels, (B, S), 1, V, dtype=jnp.int32)
    # sprinkle in numerical tokens and pads so every weight path is exercised
    labels = labels.at[0, 2].set(5).at[0, 5].set(7).at[1, 1].set(11)
    labels = labels.at[0, 7].set(pad_token_id).at[1, 6].set(pad_token_id)

    # f32 logits
    out = weighted_numeric_token_loss(
        logits, labels, numerical_token_ids,
        decay_method="exp", decay_rate=0.5, pad_token_id=pad_token_id)
    out = jax.block_until_ready(out)
    ref = _reference_loss(logits, labels, numerical_token_ids,
                          "exp", 0.5, pad_token_id)
    assert jnp.allclose(out, ref, rtol=1e-5, atol=1e-5), (out, ref)

    # bf16 logits streamed in native dtype (f32 compute happens in-kernel)
    logits_bf16 = logits.astype(jnp.bfloat16)
    out_bf16 = weighted_numeric_token_loss(
        logits_bf16, labels, numerical_token_ids,
        decay_method="exp", decay_rate=0.5, pad_token_id=pad_token_id)
    out_bf16 = jax.block_until_ready(out_bf16)
    ref_bf16 = _reference_loss(logits_bf16, labels, numerical_token_ids,
                               "exp", 0.5, pad_token_id)
    assert jnp.allclose(out_bf16, ref_bf16, rtol=1e-4, atol=1e-4), (out_bf16, ref_bf16)

    print("KERNEL_OK")
</pallas_src>

<mosaic_0001>
module attributes {stable_mosaic.version = 11 : i64} {
  func.func @_weighted_ce_kernel(%arg0: i32, %arg1: i32, %arg2: memref<16x128xf32, #tpu.memory_space<vmem>>, %arg3: memref<32x1xi32, #tpu.memory_space<vmem>>, %arg4: memref<32x1xf32, #tpu.memory_space<vmem>>, %arg5: memref<16x1xf32, #tpu.memory_space<vmem>>, %arg6: memref<16x1xf32, #tpu.memory_space<vmem>>) attributes {dimension_semantics = [#tpu.dimension_semantics<parallel>, #tpu.dimension_semantics<arbitrary>], iteration_bounds = array<i64: 2, 1>, scalar_prefetch = 0 : i64, scratch_operands = 0 : i64, tpu.core_type = #tpu.core_type<tc>, window_params = [{transform_indices = @transform_0, window_bounds = array<i64: 16, 128>}, {pipeline_mode = #tpu.pipeline_mode<synchronous>, transform_indices = @transform_1, window_bounds = array<i64: 32, 1>}, {pipeline_mode = #tpu.pipeline_mode<synchronous>, transform_indices = @transform_2, window_bounds = array<i64: 32, 1>}, {transform_indices = @transform_3, window_bounds = array<i64: 16, 1>}, {transform_indices = @transform_4, window_bounds = array<i64: 16, 1>}]} {
    %c0_i32 = arith.constant 0 : i32
    %0 = arith.cmpi eq, %arg1, %c0_i32 : i32
    %1 = arith.extui %0 : i1 to i32
    %c0_i32_0 = arith.constant 0 : i32
    %2 = arith.cmpi ne, %1, %c0_i32_0 : i32
    scf.if %2 {
      %cst_15 = arith.constant 0.000000e+00 : f32
      %36 = vector.broadcast %cst_15 : f32 to vector<16x1xf32>
      %c0_16 = arith.constant 0 : index
      %c0_17 = arith.constant 0 : index
      %37 = vector.load %arg5[%c0_16, %c0_17] : memref<16x1xf32, #tpu.memory_space<vmem>>, vector<16x1xf32>
      tpu.vector_store %arg5[%c0_16, %c0_17], %36 {strides = array<i32>} : memref<16x1xf32, #tpu.memory_space<vmem>>, vector<16x1xf32>,
      %cst_18 = arith.constant 0.000000e+00 : f32
      %38 = vector.broadcast %cst_18 : f32 to vector<16x1xf32>
      %c0_19 = arith.constant 0 : index
      %c0_20 = arith.constant 0 : index
      %39 = vector.load %arg6[%c0_19, %c0_20] : memref<16x1xf32, #tpu.memory_space<vmem>>, vector<16x1xf32>
      tpu.vector_store %arg6[%c0_19, %c0_20], %38 {strides = array<i32>} : memref<16x1xf32, #tpu.memory_space<vmem>>, vector<16x1xf32>,
    } else {
    }
    %c0 = arith.constant 0 : index
    %c0_1 = arith.constant 0 : index
    %3 = vector.load %arg2[%c0, %c0_1] : memref<16x128xf32, #tpu.memory_space<vmem>>, vector<16x128xf32>
    %c1_i32 = arith.constant 1 : i32
    %4 = arith.muli %arg0, %c1_i32 : i32
    %5 = arith.addi %4, %arg1 : i32
    %c16_i32 = arith.constant 16 : i32
    %6 = arith.muli %5, %c16_i32 : i32
    %7 = tpu.assume_multiple %6, 8 : i32
    %8 = arith.index_cast %7 : i32 to index
    %c0_2 = arith.constant 0 : index
    %9 = vector.load %arg3[%8, %c0_2] : memref<32x1xi32, #tpu.memory_space<vmem>>, vector<16x1xi32>
    %10 = arith.index_cast %7 : i32 to index
    %c0_3 = arith.constant 0 : index
    %11 = vector.load %arg4[%10, %c0_3] : memref<32x1xf32, #tpu.memory_space<vmem>>, vector<16x1xf32>
    %cst = arith.constant dense<0xFF800000> : vector<16xf32>
    %12 = vector.multi_reduction <maximumf>, %3, %cst [1] : vector<16x128xf32> to vector<16xf32>
    %13 = vector.shape_cast %12 : vector<16xf32> to vector<16x1xf32>
    %14 = vector.broadcast %13 : vector<16x1xf32> to vector<16x128xf32>
    %15 = arith.subf %3, %14 : vector<16x128xf32>
    %16 = math.exp %15 : vector<16x128xf32>
    %cst_4 = arith.constant dense<0.000000e+00> : vector<16xf32>
    %17 = vector.multi_reduction <add>, %16, %cst_4 [1] : vector<16x128xf32> to vector<16xf32>
    %18 = vector.shape_cast %17 : vector<16xf32> to vector<16x1xf32>
    %19 = math.log %18 : vector<16x1xf32>
    %20 = arith.addf %13, %19 : vector<16x1xf32>
    %21 = tpu.iota {dimensions = array<i32: 1>} : vector<16x128xi32>
    %22 = vector.broadcast %9 : vector<16x1xi32> to vector<16x128xi32>
    %23 = arith.cmpi eq, %21, %22 : vector<16x128xi32>
    %cst_5 = arith.constant 0.000000e+00 : f32
    %24 = vector.broadcast %cst_5 : f32 to vector<16x128xf32>
    %25 = arith.select %23, %3, %24 : vector<16x128xi1>, vector<16x128xf32>
    %cst_6 = arith.constant dense<0.000000e+00> : vector<16xf32>
    %26 = vector.multi_reduction <add>, %25, %cst_6 [1] : vector<16x128xf32> to vector<16xf32>
    %27 = vector.shape_cast %26 : vector<16xf32> to vector<16x1xf32>
    %28 = arith.subf %20, %27 : vector<16x1xf32>
    %c0_7 = arith.constant 0 : index
    %c0_8 = arith.constant 0 : index
    %29 = vector.load %arg5[%c0_7, %c0_8] : memref<16x1xf32, #tpu.memory_space<vmem>>, vector<16x1xf32>
    %30 = arith.mulf %28, %11 : vector<16x1xf32>
    %31 = arith.addf %29, %30 : vector<16x1xf32>
    %c0_9 = arith.constant 0 : index
    %c0_10 = arith.constant 0 : index
    %32 = vector.load %arg5[%c0_9, %c0_10] : memref<16x1xf32, #tpu.memory_space<vmem>>, vector<16x1xf32>
    tpu.vector_store %arg5[%c0_9, %c0_10], %31 {strides = array<i32>} : memref<16x1xf32, #tpu.memory_space<vmem>>, vector<16x1xf32>,
    %c0_11 = arith.constant 0 : index
    %c0_12 = arith.constant 0 : index
    %33 = vector.load %arg6[%c0_11, %c0_12] : memref<16x1xf32, #tpu.memory_space<vmem>>, vector<16x1xf32>
    %34 = arith.addf %33, %11 : vector<16x1xf32>
    %c0_13 = arith.constant 0 : index
    %c0_14 = arith.constant 0 : index
    %35 = vector.load %arg6[%c0_13, %c0_14] : memref<16x1xf32, #tpu.memory_space<vmem>>, vector<16x1xf32>
    tpu.vector_store %arg6[%c0_13, %c0_14], %34 {strides = array<i32>} : memref<16x1xf32, #tpu.memory_space<vmem>>, vector<16x1xf32>,
    return
  }
  func.func @transform_0(%arg0: i32, %arg1: i32) -> (i32, i32) {
    %c1_i32 = arith.constant 1 : i32
    %0 = arith.muli %arg0, %c1_i32 : i32
    %1 = arith.addi %0, %arg1 : i32
    %c0_i32 = arith.constant 0 : i32
    %c0_i32_0 = arith.constant 0 : i32
    return %1, %c0_i32 : i32, i32
  }
  func.func @transform_1(%arg0: i32, %arg1: i32) -> (i32, i32) {
    %c0_i32 = arith.constant 0 : i32
    %c0_i32_0 = arith.constant 0 : i32
    %c0_i32_1 = arith.constant 0 : i32
    return %c0_i32, %c0_i32_0 : i32, i32
  }
  func.func @transform_2(%arg0: i32, %arg1: i32) -> (i32, i32) {
    %c0_i32 = arith.constant 0 : i32
    %c0_i32_0 = arith.constant 0 : i32
    %c0_i32_1 = arith.constant 0 : i32
    return %c0_i32, %c0_i32_0 : i32, i32
  }
  func.func @transform_3(%arg0: i32, %arg1: i32) -> (i32, i32) {
    %c0_i32 = arith.constant 0 : i32
    %c0_i32_0 = arith.constant 0 : i32
    return %arg0, %c0_i32 : i32, i32
  }
  func.func @transform_4(%arg0: i32, %arg1: i32) -> (i32, i32) {
    %c0_i32 = arith.constant 0 : i32
    %c0_i32_0 = arith.constant 0 : i32
    return %arg0, %c0_i32 : i32, i32
  }
}

</mosaic_0001>

<bundles_post_ra>
// kernel: tpu_custom_call.1
= control target key start
LH: loop header
LB: loop body
LE: loop exit
PB: predicated region body
PF: predicated region fallthrough
CT: control target
= control target key end

     0   :  { %s512_s15 = smov 0   ;;  %s514_s16 = smov 0   ;;  %s586_s0 = inlined_call_operand.vmem [shape: f32[32,128], index: 0, kind: input, shape index: {}]   ;;  %s587_s1 = inlined_call_operand.vmem [shape: s32[32,1], index: 1, kind: input, shape index: {}]   ;;  %s588_s2 = inlined_call_operand.vmem [shape: f32[32,1], index: 2, kind: input, shape index: {}]   ;;  %s589_s3 = inlined_call_operand.vmem [shape: f32[32,1], index: 3, kind: output, shape index: {0}]   ;;  %s590_s4 = inlined_call_operand.vmem [shape: f32[32,1], index: 4, kind: output, shape index: {1}]  }
   0x1   :  { %s516_s17 = smov 0  }
   0x2 LB: > { %s27_s18 = sadd.s32 1, %s479_s16  ;;  %p415_p0 = scmp.ge.s32.totalorder %s483_s17, 1  ;;  %s483_s17 = sphi %s516_s17, %s15_s17   ;;  %s479_s16 = sphi %s514_s16, %s592_s16   ;;  %s475_s15 = sphi %s512_s15, %s591_s15  }
   0x3   : > { %p29_p1 = scmp.ge.s32.totalorder %s27_s18, 2  ;;  %p182_p2 = scmp.lt.s32.totalorder %s483_s17, 3 }
   0x5   : > { %s594_s18 = smov (%p29_p1, %s27_s18), 0  ;;  %p183_p3 = pnand %p415_p0, %p182_p2 }
   0x6   : > { %s416_s19 = sshll.u32 (!%p183_p3), %s475_s15, 1  ;;  %s422_s20 = sshll.u32 (!%p183_p3), %s475_s15, 4 }
   0x7   : > { %186 = sbr.rel (%p183_p3) target bundleno = 339 (0x153), region = 32  ;;  %p216_p4 = scmp.lt.s32.totalorder (!%p183_p3), %s416_s19, 3 }
   0x8   : > { %s247_s23 = scalar_lea.vmem (!%p183_p3), %s587_s1, %s422_s20  ;;  %s250_s10 = scalar_lea.vmem (!%p183_p3), %s588_s2, %s422_s20 }
   0xc   : > { %v485_v0 = vmov 0   ;;  %v248_v1 = vld [vmem:[%s247_s23] sm:$0xff]  ;;  %s596_s19 = smov (!%p216_p4, %s416_s19), 3  ;;  %vm238_vm0 = vcmask 7168   ;;  %v249_v2 = vld [vmem:[%s247_s23 + $0x8] sm:$0xff]  ;;  %v486_v3 = vmov 0.0   ;;  %v273_v12 = vlaneseq }
   0xd   : > { %451 = vset.pattern.permute.xlu1 %v485_v0  ;;  %452 = vset.pattern.permute.xlu0 %v485_v0  ;;  %s417_s24 = sshll.u32 %s596_s19, 3  ;;  %v251_v21 = vld [vmem:[%s250_s10] sm:$0xff]  ;;  %v252_v23 = vld [vmem:[%s250_s10 + $0x8] sm:$0xff] }
   0xe   : > { %276 = vperm.xlu1 %451, %v248_v1   ;;  %s219_s27 = scalar_lea.vmem %s586_s0, %s417_s24  ;;  %s545_s30 = scalar_lea.vmem %s589_s3, %s417_s24  ;;  %v274_v14 = vand.u32 127, %v273_v12 }
   0xf   : > { %s550_s7 = scalar_lea.vmem %s590_s4, %s417_s24  ;;  %239 = vst.msk [vmem:[%s545_s30] sm:$0xff] %vm238_vm0, %v486_v3  ;;  %v243_v4 = vld [vmem:[%s219_s27] sm:$0xff]  ;;  %240 = vst.msk [vmem:[%s545_s30 + $0x8] sm:$0xff] %vm238_vm0, %v486_v3  ;;  %v244_v5 = vld [vmem:[%s219_s27 + $0x8] sm:$0xff] }
  0x10   : > { %241 = vst.msk [vmem:[%s550_s7] sm:$0xff] %vm238_vm0, %v486_v3  ;;  %253 = vmax.xlane.f32.xlu0 %v243_v4  ;;  %242 = vst.msk [vmem:[%s550_s7 + $0x8] sm:$0xff] %vm238_vm0, %v486_v3 }
  0x12   : > { %279 = vperm.xlu1 %451, %v249_v2  }
  0x14   : > { %255 = vmax.xlane.f32.xlu0 %v244_v5 }
  0x16   : > { %v291_v35 = vld [vmem:[%s545_s30] sm:$0xff]  ;;  %v292_v38 = vld [vmem:[%s545_s30 + $0x8] sm:$0xff] }
  0x17   : > { %v300_v20 = vld [vmem:[%s550_s7] sm:$0xff]  ;;  %v301_v24 = vld [vmem:[%s550_s7 + $0x8] sm:$0xff] }
  0x18   : > { %v302_v22 = vadd.f32 %v300_v20, %v251_v21  ;;  %v303_v25 = vadd.f32 %v301_v24, %v252_v23 }
  0x1a   : > { %304 = vst.msk [vmem:[%s550_s7] sm:$0xff] %vm238_vm0, %v302_v22  ;;  %305 = vst.msk [vmem:[%s550_s7 + $0x8] sm:$0xff] %vm238_vm0, %v303_v25 }
  0x89   : > { %v277_v13 = vpop.permute.xlu1 %276 }
  0x8a   : > { %vm281_vm1 = vcmp.eq.s32.totalorder %v274_v14, %v277_v13 }
  0x8b   : > { %v283_v17 = vsel %vm281_vm1, %v243_v4, 0.0 }
  0x8d   : > { %v280_v16 = vpop.permute.xlu1 %279 }
  0x8e   : > { %vm282_vm2 = vcmp.eq.s32.totalorder %v274_v14, %v280_v16 }
  0x8f   : > { %v284_v19 = vsel %vm282_vm2, %v244_v5, 0.0 }
  0x99   : > { %v254_v6 = vpop.xlane.xlu0 %253 }
  0x9a   : > { %v257_v7 = vsub.f32 %v243_v4, %v254_v6 }
  0x9c   : > { %v259_v8 = vmul.f32 1.442695, %v257_v7 }
  0x9d   : > { %v256_v9 = vpop.xlane.xlu0 %255 }
  0x9e   : > { %453 = vpow2.f32 %v259_v8  ;;  %v258_v10 = vsub.f32 %v244_v5, %v256_v9 }
  0xa0   : > { %v261_v11 = vmul.f32 1.442695, %v258_v10 }
  0xa2   : > { %455 = vpow2.f32 %v261_v11 }
  0xab   : > { %v454_v15 = vpop.eup %453 }
  0xac   : > { %263 = vadd.xlane.f32.xlu0 %v454_v15 }
  0xaf   : > { %v456_v18 = vpop.eup %455 }
  0xb0   : > { %265 = vadd.xlane.f32.xlu1 %v456_v18  ;;  %285 = vadd.xlane.f32.xlu0 %v283_v17 }
  0xb4   : > { %287 = vadd.xlane.f32.xlu0 %v284_v19 }
 0x135   : > { %v264_v26 = vpop.xlane.xlu0 %263 }
 0x136   : > { %457 = vlog2.f32 %v264_v26 }
 0x139   : > { %v266_v27 = vpop.xlane.xlu1 %265  ;;  %v286_v30 = vpop.xlane.xlu0 %285 }
 0x13a   : > { %459 = vlog2.f32 %v266_v27 }
 0x13d   : > { %v288_v39 = vpop.xlane.xlu0 %287 }
 0x143   : > { %v458_v28 = vpop.eup %457 }
 0x144   : > { %v268_v29 = vmul.f32 0.6931472, %v458_v28 }
 0x146   : > { %v271_v31 = vadd.f32 %v268_v29, %v254_v6 }
 0x147   : > { %v460_v32 = vpop.eup %459 }
 0x148   : > { %v270_v33 = vmul.f32 0.6931472, %v460_v32  ;;  %v289_v34 = vsub.f32 %v271_v31, %v286_v30 }
 0x14a   : > { %v293_v36 = vmul.f32 %v289_v34, %v251_v21  ;;  %v272_v37 = vadd.f32 %v270_v33, %v256_v9 }
 0x14c   : > { %v295_v40 = vadd.f32 %v293_v36, %v291_v35  ;;  %v290_v41 = vsub.f32 %v272_v37, %v288_v39 }
 0x14e   : > { %298 = vst.msk [vmem:[%s545_s30] sm:$0xff] %vm238_vm0, %v295_v40  ;;  %v294_v42 = vmul.f32 %v290_v41, %v252_v23 }
 0x150   : > { %v296_v43 = vadd.f32 %v294_v42, %v292_v38 }
 0x152   : > { %299 = vst.msk [vmem:[%s545_s30 + $0x8] sm:$0xff] %vm238_vm0, %v296_v43 }
 0x153 PF: > { %s15_s17 = sadd.s32 1, %s483_s17   ;;  %s591_s15 = smov %s479_s16 }
 0x154   : > { %p12_p5 = scmp.ge.s32.totalorder %s15_s17, 4   ;;  %s592_s16 = smov %s594_s18 }
 0x156   :  { %14 = sbr.rel (!%p12_p5) target bundleno = 2 (0x2), region = 80 }

</bundles_post_ra>
